<compile_context>
chip_gen: v7x
topology: tpu7x:2x2x1
jax: 0.10.0
libtpu: 0.0.40
codegen_flags: <defaults>
</compile_context>

<pallas_src>
import functools

import jax
import jax.numpy as jnp
from jax.experimental import pallas as pl
from jax.experimental.pallas import tpu as pltpu

LANE = 128
MAX_TILE_ROWS = 2048          # 2048 x 128 x 4B = 1 MiB per input block
NUM_SPLITS_TARGET = 2         # leading "parallel" axis (both TCs on v7x)


def _bce_dice_kernel(pred_ref, tgt_ref, out_ref, acc_ref, *, n_elems):
    c = pl.program_id(0)            # parallel split index
    i = pl.program_id(1)            # sequential tile index within the split
    inner = pl.num_programs(1)

    @pl.when(i == 0)
    def _():
        acc_ref[...] = jnp.zeros_like(acc_ref)

    p = pred_ref[...].astype(jnp.float32)        # (tile_rows, LANE)
    t = tgt_ref[...].astype(jnp.float32)
    tile_rows = p.shape[0]

    # Validity mask rebuilt from the global element index (no mask HBM stream).
    block_idx = c * inner + i
    row_ids = block_idx * tile_rows + jax.lax.broadcasted_iota(
        jnp.int32, (tile_rows, LANE), 0)
    col_ids = jax.lax.broadcasted_iota(jnp.int32, (tile_rows, LANE), 1)
    full_rows = n_elems // LANE
    rem = n_elems % LANE
    m = ((row_ids < full_rows)
         | ((row_ids == full_rows) & (col_ids < rem))).astype(jnp.float32)

    # --- BCE term (pred treated as probabilities, as in nn.BCELoss) ---
    # PyTorch clamps the log terms at -100.
    log_p = jnp.maximum(jnp.log(p), -100.0)
    log_1mp = jnp.maximum(jnp.log(1.0 - p), -100.0)
    bce = -(t * log_p + (1.0 - t) * log_1mp)

    # --- Dice term operates on sigmoid(pred), matching the PyTorch module ---
    s = jax.nn.sigmoid(p)

    # vreg-shaped partial sums: VPU adds across vregs; no per-step XLU reduce.
    def part(x):
        return (x * m).reshape(-1, 8, LANE).sum(axis=0)   # (8, LANE)

    acc_ref[0] += part(bce)          # sum of per-element BCE
    acc_ref[1] += part(s * t)        # intersection
    acc_ref[2] += part(s + t)        # union = sum(s) + sum(t), fused

    @pl.when(i == inner - 1)
    def _():
        out_ref[0] = acc_ref[...]


def bce_dice_loss(pred, target, smooth=0.01):
    """pred, target: NCHW arrays (pred must hold probabilities in (0,1))."""
    assert pred.shape == target.shape
    n_elems = int(pred.size)

    flat_p = pred.reshape(-1).astype(jnp.float32)
    flat_t = target.reshape(-1).astype(jnp.float32)

    rows = pl.cdiv(n_elems, LANE)
    tile_rows = min(MAX_TILE_ROWS, ((rows + 7) // 8) * 8)   # multiple of 8
    tiles = pl.cdiv(rows, tile_rows)
    num_splits = NUM_SPLITS_TARGET if tiles >= NUM_SPLITS_TARGET else 1
    inner_tiles = pl.cdiv(tiles, num_splits)
    rows_padded = num_splits * inner_tiles * tile_rows
    pad = rows_padded * LANE - n_elems
    if pad:
        # pad pred with 0.5 (finite & log-safe), target with 0; the in-kernel
        # index mask zeroes any contribution from padded elements.
        flat_p = jnp.pad(flat_p, (0, pad), constant_values=0.5)
        flat_t = jnp.pad(flat_t, (0, pad), constant_values=0.0)

    p2 = flat_p.reshape(rows_padded, LANE)
    t2 = flat_t.reshape(rows_padded, LANE)

    kernel = functools.partial(_bce_dice_kernel, n_elems=n_elems)
    in_spec = pl.BlockSpec((tile_rows, LANE),
                           lambda c, i: (c * inner_tiles + i, 0))

    # Double-buffered VMEM footprint: 2 inputs x 2 bufs x <=1 MiB = <=4 MiB,
    # comfortably inside the default scoped-VMEM limit on v5e/v6e/v7x.
    partials = pl.pallas_call(
        kernel,
        out_shape=jax.ShapeDtypeStruct((num_splits, 3, 8, LANE), jnp.float32),
        grid_spec=pltpu.PrefetchScalarGridSpec(
            num_scalar_prefetch=0,
            grid=(num_splits, inner_tiles),
            in_specs=[in_spec, in_spec],
            out_specs=pl.BlockSpec((1, 3, 8, LANE),
                                   lambda c, i: (c, 0, 0, 0)),
            scratch_shapes=[pltpu.VMEM((3, 8, LANE), jnp.float32)],
        ),
        compiler_params=pltpu.CompilerParams(
            dimension_semantics=("parallel", "arbitrary")),
    )(p2, t2)

    # Tiny epilogue (num_splits*3*8*128 floats): final reduce + scalar combine.
    totals = jnp.sum(partials, axis=(0, 2, 3))             # (3,)
    bce_mean = totals[0] / n_elems
    dice = (2.0 * totals[1] + smooth) / (totals[2] + smooth)
    return (1.0 - dice) + bce_mean


def _reference_loss(pred, target, smooth=0.01):
    p = pred.astype(jnp.float32)
    t = target.astype(jnp.float32)
    log_p = jnp.maximum(jnp.log(p), -100.0)
    log_1mp = jnp.maximum(jnp.log(1.0 - p), -100.0)
    bce = jnp.mean(-(t * log_p + (1.0 - t) * log_1mp))
    s = jax.nn.sigmoid(p)
    intersect = jnp.sum(s * t)
    union = jnp.sum(s) + jnp.sum(t)
    dice = (2.0 * intersect + smooth) / (union + smooth)
    return (1.0 - dice) + bce


if __name__ == "__main__":
    key = jax.random.PRNGKey(0)
    k1, k2 = jax.random.split(key)

    N, C, H, W = 2, 4, 16, 16
    # pred must be probabilities (nn.BCELoss on raw pred), target is binary.
    pred = jax.random.uniform(k1, (N, C, H, W), jnp.float32,
                              minval=0.01, maxval=0.99)
    target = (jax.random.uniform(k2, (N, C, H, W), jnp.float32) > 0.5
              ).astype(jnp.float32)

    loss = bce_dice_loss(pred, target)
    loss = jax.block_until_ready(loss)

    ref = _reference_loss(pred, target)
    assert jnp.allclose(loss, ref, rtol=1e-5, atol=1e-5), (loss, ref)

    print("KERNEL_OK")
</pallas_src>

<mosaic_0001>
module attributes {stable_mosaic.version = 11 : i64} {
  func.func @_bce_dice_kernel(%arg0: i32, %arg1: i32, %arg2: memref<16x128xf32, #tpu.memory_space<vmem>>, %arg3: memref<16x128xf32, #tpu.memory_space<vmem>>, %arg4: memref<1x3x8x128xf32, #tpu.memory_space<vmem>>, %arg5: memref<3x8x128xf32, #tpu.memory_space<vmem>>) attributes {dimension_semantics = [#tpu.dimension_semantics<parallel>, #tpu.dimension_semantics<arbitrary>], iteration_bounds = array<i64: 1, 1>, scalar_prefetch = 0 : i64, scratch_operands = 1 : i64, tpu.core_type = #tpu.core_type<tc>, window_params = [{transform_indices = @transform_0, window_bounds = array<i64: 16, 128>}, {transform_indices = @transform_1, window_bounds = array<i64: 16, 128>}, {transform_indices = @transform_2, window_bounds = array<i64: 1, 3, 8, 128>}]} {
    %c0_i32 = arith.constant 0 : i32
    %0 = arith.cmpi eq, %arg1, %c0_i32 : i32
    %1 = arith.extui %0 : i1 to i32
    %c0_i32_0 = arith.constant 0 : i32
    %2 = arith.cmpi ne, %1, %c0_i32_0 : i32
    scf.if %2 {
      %cst_33 = arith.constant 0.000000e+00 : f32
      %74 = vector.broadcast %cst_33 : f32 to vector<3x8x128xf32>
      %c0_34 = arith.constant 0 : index
      %c0_35 = arith.constant 0 : index
      %c0_36 = arith.constant 0 : index
      %75 = vector.load %arg5[%c0_34, %c0_35, %c0_36] : memref<3x8x128xf32, #tpu.memory_space<vmem>>, vector<3x8x128xf32>
      tpu.vector_store %arg5[%c0_34, %c0_35, %c0_36], %74 {strides = array<i32>} : memref<3x8x128xf32, #tpu.memory_space<vmem>>, vector<3x8x128xf32>,
    } else {
    }
    %c0 = arith.constant 0 : index
    %c0_1 = arith.constant 0 : index
    %3 = vector.load %arg2[%c0, %c0_1] : memref<16x128xf32, #tpu.memory_space<vmem>>, vector<16x128xf32>
    %c0_2 = arith.constant 0 : index
    %c0_3 = arith.constant 0 : index
    %4 = vector.load %arg3[%c0_2, %c0_3] : memref<16x128xf32, #tpu.memory_space<vmem>>, vector<16x128xf32>
    %c1_i32 = arith.constant 1 : i32
    %5 = arith.muli %arg0, %c1_i32 : i32
    %6 = arith.addi %5, %arg1 : i32
    %c16_i32 = arith.constant 16 : i32
    %7 = arith.muli %6, %c16_i32 : i32
    %8 = tpu.iota {dimensions = array<i32: 0>} : vector<16x128xi32>
    %9 = vector.broadcast %7 : i32 to vector<16x128xi32>
    %10 = arith.addi %9, %8 : vector<16x128xi32>
    %11 = tpu.iota {dimensions = array<i32: 1>} : vector<16x128xi32>
    %c16_i32_4 = arith.constant 16 : i32
    %12 = vector.broadcast %c16_i32_4 : i32 to vector<16x128xi32>
    %13 = arith.cmpi slt, %10, %12 : vector<16x128xi32>
    %c16_i32_5 = arith.constant 16 : i32
    %14 = vector.broadcast %c16_i32_5 : i32 to vector<16x128xi32>
    %15 = arith.cmpi eq, %10, %14 : vector<16x128xi32>
    %c0_i32_6 = arith.constant 0 : i32
    %16 = vector.broadcast %c0_i32_6 : i32 to vector<16x128xi32>
    %17 = arith.cmpi slt, %11, %16 : vector<16x128xi32>
    %18 = arith.andi %15, %17 : vector<16x128xi1>
    %19 = arith.ori %13, %18 : vector<16x128xi1>
    %20 = arith.extui %19 : vector<16x128xi1> to vector<16x128xi32>
    %21 = arith.sitofp %20 : vector<16x128xi32> to vector<16x128xf32>
    %22 = math.log %3 : vector<16x128xf32>
    %cst = arith.constant -1.000000e+02 : f32
    %23 = vector.broadcast %cst : f32 to vector<16x128xf32>
    %24 = arith.maximumf %22, %23 : vector<16x128xf32>
    %cst_7 = arith.constant 1.000000e+00 : f32
    %25 = vector.broadcast %cst_7 : f32 to vector<16x128xf32>
    %26 = arith.subf %25, %3 : vector<16x128xf32>
    %27 = math.log %26 : vector<16x128xf32>
    %cst_8 = arith.constant -1.000000e+02 : f32
    %28 = vector.broadcast %cst_8 : f32 to vector<16x128xf32>
    %29 = arith.maximumf %27, %28 : vector<16x128xf32>
    %30 = arith.mulf %4, %24 : vector<16x128xf32>
    %cst_9 = arith.constant 1.000000e+00 : f32
    %31 = vector.broadcast %cst_9 : f32 to vector<16x128xf32>
    %32 = arith.subf %31, %4 : vector<16x128xf32>
    %33 = arith.mulf %32, %29 : vector<16x128xf32>
    %34 = arith.addf %30, %33 : vector<16x128xf32>
    %cst_10 = arith.constant 0.000000e+00 : f32
    %35 = vector.broadcast %cst_10 : f32 to vector<16x128xf32>
    %36 = arith.subf %35, %34 : vector<16x128xf32>
    %37 = arith.negf %3 : vector<16x128xf32>
    %38 = math.exp %37 : vector<16x128xf32>
    %cst_11 = arith.constant 1.000000e+00 : f32
    %39 = vector.broadcast %cst_11 : f32 to vector<16x128xf32>
    %40 = arith.addf %39, %38 : vector<16x128xf32>
    %41 = arith.divf %39, %40 : vector<16x128xf32>
    %c0_12 = arith.constant 0 : index
    %c0_13 = arith.constant 0 : index
    %c0_14 = arith.constant 0 : index
    %42 = vector.load %arg5[%c0_12, %c0_13, %c0_14] : memref<3x8x128xf32, #tpu.memory_space<vmem>>, vector<1x8x128xf32>
    %43 = vector.shape_cast %42 : vector<1x8x128xf32> to vector<8x128xf32>
    %44 = arith.mulf %36, %21 : vector<16x128xf32>
    %45 = vector.shape_cast %44 : vector<16x128xf32> to vector<2x8x128xf32>
    %cst_15 = arith.constant dense<0.000000e+00> : vector<8x128xf32>
    %46 = vector.multi_reduction <add>, %45, %cst_15 [0] : vector<2x8x128xf32> to vector<8x128xf32>
    %47 = arith.addf %43, %46 : vector<8x128xf32>
    %c0_16 = arith.constant 0 : index
    %c0_17 = arith.constant 0 : index
    %c0_18 = arith.constant 0 : index
    %48 = vector.load %arg5[%c0_16, %c0_17, %c0_18] : memref<3x8x128xf32, #tpu.memory_space<vmem>>, vector<1x8x128xf32>
    %49 = vector.shape_cast %48 : vector<1x8x128xf32> to vector<8x128xf32>
    %50 = vector.shape_cast %47 : vector<8x128xf32> to vector<1x8x128xf32>
    tpu.vector_store %arg5[%c0_16, %c0_17, %c0_18], %50 {strides = array<i32>} : memref<3x8x128xf32, #tpu.memory_space<vmem>>, vector<1x8x128xf32>,
    %c1 = arith.constant 1 : index
    %c0_19 = arith.constant 0 : index
    %c0_20 = arith.constant 0 : index
    %51 = vector.load %arg5[%c1, %c0_19, %c0_20] : memref<3x8x128xf32, #tpu.memory_space<vmem>>, vector<1x8x128xf32>
    %52 = vector.shape_cast %51 : vector<1x8x128xf32> to vector<8x128xf32>
    %53 = arith.mulf %41, %4 : vector<16x128xf32>
    %54 = arith.mulf %53, %21 : vector<16x128xf32>
    %55 = vector.shape_cast %54 : vector<16x128xf32> to vector<2x8x128xf32>
    %cst_21 = arith.constant dense<0.000000e+00> : vector<8x128xf32>
    %56 = vector.multi_reduction <add>, %55, %cst_21 [0] : vector<2x8x128xf32> to vector<8x128xf32>
    %57 = arith.addf %52, %56 : vector<8x128xf32>
    %c1_22 = arith.constant 1 : index
    %c0_23 = arith.constant 0 : index
    %c0_24 = arith.constant 0 : index
    %58 = vector.load %arg5[%c1_22, %c0_23, %c0_24] : memref<3x8x128xf32, #tpu.memory_space<vmem>>, vector<1x8x128xf32>
    %59 = vector.shape_cast %58 : vector<1x8x128xf32> to vector<8x128xf32>
    %60 = vector.shape_cast %57 : vector<8x128xf32> to vector<1x8x128xf32>
    tpu.vector_store %arg5[%c1_22, %c0_23, %c0_24], %60 {strides = array<i32>} : memref<3x8x128xf32, #tpu.memory_space<vmem>>, vector<1x8x128xf32>,
    %c2 = arith.constant 2 : index
    %c0_25 = arith.constant 0 : index
    %c0_26 = arith.constant 0 : index
    %61 = vector.load %arg5[%c2, %c0_25, %c0_26] : memref<3x8x128xf32, #tpu.memory_space<vmem>>, vector<1x8x128xf32>
    %62 = vector.shape_cast %61 : vector<1x8x128xf32> to vector<8x128xf32>
    %63 = arith.addf %41, %4 : vector<16x128xf32>
    %64 = arith.mulf %63, %21 : vector<16x128xf32>
    %65 = vector.shape_cast %64 : vector<16x128xf32> to vector<2x8x128xf32>
    %cst_27 = arith.constant dense<0.000000e+00> : vector<8x128xf32>
    %66 = vector.multi_reduction <add>, %65, %cst_27 [0] : vector<2x8x128xf32> to vector<8x128xf32>
    %67 = arith.addf %62, %66 : vector<8x128xf32>
    %c2_28 = arith.constant 2 : index
    %c0_29 = arith.constant 0 : index
    %c0_30 = arith.constant 0 : index
    %68 = vector.load %arg5[%c2_28, %c0_29, %c0_30] : memref<3x8x128xf32, #tpu.memory_space<vmem>>, vector<1x8x128xf32>
    %69 = vector.shape_cast %68 : vector<1x8x128xf32> to vector<8x128xf32>
    %70 = vector.shape_cast %67 : vector<8x128xf32> to vector<1x8x128xf32>
    tpu.vector_store %arg5[%c2_28, %c0_29, %c0_30], %70 {strides = array<i32>} : memref<3x8x128xf32, #tpu.memory_space<vmem>>, vector<1x8x128xf32>,
    %c0_i32_31 = arith.constant 0 : i32
    %71 = arith.cmpi eq, %arg1, %c0_i32_31 : i32
    %72 = arith.extui %71 : i1 to i32
    %c0_i32_32 = arith.constant 0 : i32
    %73 = arith.cmpi ne, %72, %c0_i32_32 : i32
    scf.if %73 {
      %c0_33 = arith.constant 0 : index
      %c0_34 = arith.constant 0 : index
      %c0_35 = arith.constant 0 : index
      %74 = vector.load %arg5[%c0_33, %c0_34, %c0_35] : memref<3x8x128xf32, #tpu.memory_space<vmem>>, vector<3x8x128xf32>
      %c0_36 = arith.constant 0 : index
      %c0_37 = arith.constant 0 : index
      %c0_38 = arith.constant 0 : index
      %c0_39 = arith.constant 0 : index
      %75 = vector.load %arg4[%c0_36, %c0_37, %c0_38, %c0_39] : memref<1x3x8x128xf32, #tpu.memory_space<vmem>>, vector<1x3x8x128xf32>
      %76 = vector.shape_cast %75 : vector<1x3x8x128xf32> to vector<3x8x128xf32>
      %77 = vector.shape_cast %74 : vector<3x8x128xf32> to vector<1x3x8x128xf32>
      tpu.vector_store %arg4[%c0_36, %c0_37, %c0_38, %c0_39], %77 {strides = array<i32>} : memref<1x3x8x128xf32, #tpu.memory_space<vmem>>, vector<1x3x8x128xf32>,
    } else {
    }
    return
  }
  func.func @transform_0(%arg0: i32, %arg1: i32) -> (i32, i32) {
    %c1_i32 = arith.constant 1 : i32
    %0 = arith.muli %arg0, %c1_i32 : i32
    %1 = arith.addi %0, %arg1 : i32
    %c0_i32 = arith.constant 0 : i32
    %c0_i32_0 = arith.constant 0 : i32
    return %1, %c0_i32 : i32, i32
  }
  func.func @transform_1(%arg0: i32, %arg1: i32) -> (i32, i32) {
    %c1_i32 = arith.constant 1 : i32
    %0 = arith.muli %arg0, %c1_i32 : i32
    %1 = arith.addi %0, %arg1 : i32
    %c0_i32 = arith.constant 0 : i32
    %c0_i32_0 = arith.constant 0 : i32
    return %1, %c0_i32 : i32, i32
  }
  func.func @transform_2(%arg0: i32, %arg1: i32) -> (i32, i32, i32, i32) {
    %c0_i32 = arith.constant 0 : i32
    %c0_i32_0 = arith.constant 0 : i32
    %c0_i32_1 = arith.constant 0 : i32
    %c0_i32_2 = arith.constant 0 : i32
    return %arg0, %c0_i32, %c0_i32_0, %c0_i32_1 : i32, i32, i32, i32
  }
}

</mosaic_0001>

<bundles_post_ra>
// kernel: tpu_custom_call.1
= control target key start
LH: loop header
LB: loop body
LE: loop exit
PB: predicated region body
PF: predicated region fallthrough
CT: control target
= control target key end

     0   :  { %7 = vsyncpa [#allocation4], 0  ;;  %s333_s0 = inlined_call_operand.hbm [shape: f32[16,128], index: 0, kind: input, shape index: {}]   ;;  %s334_s1 = inlined_call_operand.hbm [shape: f32[16,128], index: 1, kind: input, shape index: {}]   ;;  %s335_s2 = inlined_call_operand.hbm [shape: f32[1,3,8,128], index: 2, kind: output, shape index: {}]  }
   0x1   :  { %8 = vsyncpa [#allocation7], 0 }
   0x2   :  { %9 = vsyncpa [#allocation5], 0  ;;  %s268_s9 = smov [#allocation3]   ;;  %s196_s13 = scalar_lea.hbm %s333_s0, 256 }
   0x3   :  { %s19_s10 = sshll.u32 %s268_s9, 4  ;;  %p197_p0 = scmp.ne.s32.totalorder %s333_s0, %s196_s13  ;;  %s20_s10 = int_to_ptr.vmem [resolvable:$true] %s19_s10 }
   0x4   :  { %p200_p1 = scmp.lt.u32.totalorder %s196_s13, %s333_s0 }
   0x6   :  { %p202_p2 = pnand %p200_p1, %p197_p0 }
   0x8   :  { %205 = shalt.err (!%p202_p2)
}
   0x9   :  { %s206_s18 = scalar_lea.vmem %s20_s10, 256  ;;  %p211_p4 = scmp.lt.s32.totalorder %s20_s10, %s20_s10 }
   0xa   :  { %p207_p3 = scmp.ne.s32.totalorder %s20_s10, %s206_s18  ;;  %p212_p5 = scmp.lt.s32.totalorder %s206_s18, %s206_s18 }
   0xc   :  { %p213_p6 = por %p212_p5, %p211_p4 }
   0xe   :  { %p214_p7 = pnand %p213_p6, %p207_p3 }
  0x10   :  { %217 = shalt.err (!%p214_p7)
}
  0x11   :  { %s269_s19 = smov 128   ;;  %s270_s20 = smov 8  }
  0x12   :  { %25 = dma.hbm_to_vmem [thread:$0]  %s333_s0, 256, %s20_s10, [#allocation4], %s269_s19, %s269_s19, %s270_s20  }
  0x13   :  { %s271_s23 = smov [#allocation6]   ;;  %s218_s27 = scalar_lea.hbm %s334_s1, 256 }
  0x14   :  { %s35_s24 = sshll.u32 %s271_s23, 4  ;;  %p219_p8 = scmp.ne.s32.totalorder %s334_s1, %s218_s27  ;;  %s36_s24 = int_to_ptr.vmem [resolvable:$true] %s35_s24 }
  0x15   :  { %p222_p9 = scmp.lt.u32.totalorder %s218_s27, %s334_s1 }
  0x17   :  { %p224_p10 = pnand %p222_p9, %p219_p8 }
  0x19   :  { %227 = shalt.err (!%p224_p10)
}
  0x1a   :  { %s228_s4 = scalar_lea.vmem %s36_s24, 256  ;;  %p233_p12 = scmp.lt.s32.totalorder %s36_s24, %s36_s24 }
  0x1b   :  { %p229_p11 = scmp.ne.s32.totalorder %s36_s24, %s228_s4  ;;  %p234_p13 = scmp.lt.s32.totalorder %s228_s4, %s228_s4 }
  0x1d   :  { %p235_p0 = por %p234_p13, %p233_p12 }
  0x1f   :  { %p236_p1 = pnand %p235_p0, %p229_p11 }
  0x21   :  { %239 = shalt.err (!%p236_p1)
}
  0x22   :  { %41 = dma.hbm_to_vmem [thread:$0]  %s334_s1, 256, %s36_s24, [#allocation7], %s269_s19, %s269_s19, %s270_s20  }
  0x23   :  { %262 = dma.done.wait [#allocation4], 256  }
  0x24   :  { %263 = vsyncadd [#allocation4], 4294967040 }
  0x25   :  { %264 = dma.done.wait [#allocation7], 256  }
  0x26   :  { %265 = vsyncadd [#allocation7], 4294967040  ;;  %v59_v0 = vld [vmem:[#allocation3] sm:$0xff]  ;;  %v60_v1 = vld [vmem:[#allocation3 + $0x8] sm:$0xff]  ;;  %s272_s1 = smov [#allocation8]  }
  0x27   :  { %180 = vlog2.f32 %v59_v0  ;;  %v92_v2 = vsub.f32 1.0, %v59_v0  ;;  %v93_v3 = vsub.f32 1.0, %v60_v1  ;;  %v173_v4 = vmul.f32 -1.442695, %v59_v0  ;;  %v61_v7 = vld [vmem:[#allocation6] sm:$0xff]  ;;  %v62_v9 = vld [vmem:[#allocation6 + $0x8] sm:$0xff] }
  0x28   :  { %182 = vlog2.f32 %v60_v1  ;;  %v174_v5 = vmul.f32 -1.442695, %v60_v1  ;;  %v102_v16 = vsub.f32 1.0, %v61_v7  ;;  %v103_v20 = vsub.f32 1.0, %v62_v9  ;;  %s160_s6 = sshll.u32 %s272_s1, 4  ;;  %s161_s6 = int_to_ptr.vmem [resolvable:$true] %s160_s6 }
  0x29   :  { %184 = vlog2.f32 %v92_v2  ;;  %s240_s7 = scalar_lea.vmem %s161_s6, 384  ;;  %p245_p3 = scmp.lt.s32.totalorder %s161_s6, %s161_s6 }
  0x2a   :  { %186 = vlog2.f32 %v93_v3  ;;  %p241_p2 = scmp.ne.s32.totalorder %s161_s6, %s240_s7  ;;  %p246_p4 = scmp.lt.s32.totalorder %s240_s7, %s240_s7 }
  0x2b   :  { %188 = vpow2.f32 %v173_v4 }
  0x2c   :  { %190 = vpow2.f32 %v174_v5  ;;  %p247_p5 = por %p246_p4, %p245_p3 }
  0x2e   :  { %p248_p6 = pnand %p247_p5, %p241_p2 }
  0x31   :  { %v181_v6 = vpop.eup %180 }
  0x32   :  { %v183_v8 = vpop.eup %182  ;;  %v87_v10 = vmul.f32 0.6931472, %v181_v6 }
  0x33   :  { %v185_v11 = vpop.eup %184  ;;  %v89_v12 = vmul.f32 0.6931472, %v183_v8 }
  0x34   :  { %v187_v13 = vpop.eup %186  ;;  %v90_v14 = vmax.f32 %v87_v10, -100.0  ;;  %v95_v15 = vmul.f32 0.6931472, %v185_v11 }
  0x35   :  { %v189_v17 = vpop.eup %188  ;;  %v91_v18 = vmax.f32 %v89_v12, -100.0  ;;  %v97_v19 = vmul.f32 0.6931472, %v187_v13 }
  0x36   :  { %v191_v21 = vpop.eup %190  ;;  %v98_v22 = vmax.f32 %v95_v15, -100.0  ;;  %v100_v23 = vmul.f32 %v90_v14, %v61_v7  ;;  %v116_v24 = vadd.f32 1.0, %v189_v17 }
  0x37   :  { %v99_v25 = vmax.f32 %v97_v19, -100.0  ;;  %v101_v26 = vmul.f32 %v91_v18, %v62_v9  ;;  %v117_v27 = vadd.f32 1.0, %v191_v21 }
  0x38   :  { %v104_v28 = vmul.f32 %v102_v16, %v98_v22  ;;  %192 = vrcp.f32 %v116_v24 }
  0x39   :  { %v105_v29 = vmul.f32 %v103_v20, %v99_v25  ;;  %194 = vrcp.f32 %v117_v27 }
  0x3a   :  { %v106_v30 = vadd.f32 %v104_v28, %v100_v23 }
  0x3b   :  { %v107_v31 = vadd.f32 %v105_v29, %v101_v26 }
  0x3c   :  { %v108_v32 = vsub.f32 0.0, %v106_v30 }
  0x3d   :  { %v109_v33 = vsub.f32 0.0, %v107_v31 }
  0x3f   :  { %v125_v34 = vadd.f32 %v109_v33, %v108_v32 }
  0x41   :  { %152 = vst [vmem:[#allocation8] sm:$0xff] %v125_v34 }
  0x42   :  { %v193_v35 = vpop.eup %192 }
  0x43   :  { %v195_v36 = vpop.eup %194  ;;  %v130_v37 = vmul.f32 %v193_v35, %v61_v7  ;;  %v139_v38 = vadd.f32 %v193_v35, %v61_v7 }
  0x44   :  { %v131_v39 = vmul.f32 %v195_v36, %v62_v9  ;;  %v140_v40 = vadd.f32 %v195_v36, %v62_v9 }
  0x46   :  { %v134_v41 = vadd.f32 %v131_v39, %v130_v37  ;;  %v143_v42 = vadd.f32 %v140_v40, %v139_v38 }
  0x48   :  { %153 = vst [vmem:[#allocation8 + $0x8] sm:$0xff] %v134_v41  ;;  %154 = vst [vmem:[#allocation8 + $0x10] sm:$0xff] %v143_v42 }
  0x49   :  { %251 = shalt.err (!%p248_p6)
}
  0x4a   :  { %s252_s10 = scalar_lea.hbm %s335_s2, 384 }
  0x4b   :  { %p253_p7 = scmp.ne.s32.totalorder %s335_s2, %s252_s10  ;;  %p256_p8 = scmp.lt.u32.totalorder %s252_s10, %s335_s2 }
  0x4d   :  { %p258_p9 = pnand %p256_p8, %p253_p7 }
  0x4f   :  { %261 = shalt.err (!%p258_p9)
}
  0x50   :  { %166 = dma.vmem_to_hbm [thread:$0]  %s161_s6, 384, %s335_s2, [#allocation5], %s269_s19, %s269_s19, %s270_s20  }
  0x51   :  { %266 = dma.done.wait [#allocation5], 384  }
  0x52   :  { %267 = vsyncadd [#allocation5], 4294966912 }
  0x53   :  { %170 = vsyncpa [#allocation4], 1 }
  0x54   :  { %171 = vsyncpa [#allocation7], 1 }
  0x55   :  { %172 = vsyncpa [#allocation5], 1 }

</bundles_post_ra>
